<compile_context>
chip_gen: v6e
topology: v6e:2x2x1
jax: 0.10.0
libtpu: 0.0.40
codegen_flags: <defaults>
</compile_context>

<pallas_src>
import functools

import jax
import jax.numpy as jnp
from jax.experimental import pallas as pl
from jax.experimental.pallas import tpu as pltpu


def _centroids_kernel(y_ref, mask_ref, x_ref, cent_ref, out_ref,
                      sum_ref, cnt_ref, *, num_classes, decay,
                      n_samples, tile_n, ragged):
    i = pl.program_id(1)            # N axis (innermost reduction)

    @pl.when(i == 0)
    def _init():
        sum_ref[...] = jnp.zeros_like(sum_ref)
        cnt_ref[...] = jnp.zeros_like(cnt_ref)

    y = y_ref[...]                  # (1, TN)  int32 labels (host pads with -1)
    mask = mask_ref[...]            # (1, TN)  f32 sample mask (host pads with 0)
    x = x_ref[...]                  # (TN, TF) features, native dtype

    if ragged:
        # Last N tile may extend past the real array: zero undefined rows so the
        # MXU never sees 0 * NaN from garbage padded data (select, not multiply).
        rows_left = n_samples - i * tile_n
        row_iota = jax.lax.broadcasted_iota(jnp.int32, (x.shape[0], 1), 0)
        x = jnp.where(row_iota < rows_left, x, jnp.zeros_like(x))

    tn = y.shape[1]
    # (C, TN) one-hot membership: onehot[c, j] = 1 iff y[j] == c.  Padded columns
    # carry y == -1 so they never match.
    cls_iota = jax.lax.broadcasted_iota(jnp.int32, (num_classes, tn), 0)
    onehot_b = (y == cls_iota)                              # bool (C, TN)
    onehot_x = onehot_b.astype(x.dtype)                     # lossless 0/1, x's dtype (bf16 halves footprint)
    onehot_m = onehot_x * mask.astype(x.dtype)              # masked membership

    # Per-class feature sums: one MXU matmul per (F, N) tile, f32 accumulation.
    sum_ref[...] += jnp.dot(onehot_m, x, preferred_element_type=jnp.float32)

    # Masked counts (col 0) and unmasked presence counts (col 1) via a single
    # small MXU dot contracting over TN (no cross-lane XLU reductions).  Counts
    # accumulate in f32 -> exact for per-class counts below ~2^24.
    onehot_f = onehot_b.astype(jnp.float32)
    cnt_rhs = jnp.concatenate([mask, jnp.ones_like(mask)], axis=0)       # (2, TN)
    cnt_ref[...] += jax.lax.dot_general(
        onehot_f, cnt_rhs, (((1,), (1,)), ((), ())),
        preferred_element_type=jnp.float32)                              # (C, 2)

    @pl.when(i == pl.num_programs(1) - 1)
    def _finalize():
        cent = cent_ref[...].astype(jnp.float32)            # (C, TF)
        counts = cnt_ref[:, 0:1]                            # masked per-class counts
        present = cnt_ref[:, 1:2] > 0.0                     # torch.unique ignores mask
        # EUP approximate reciprocal + one Newton step -> ~f32-exact divide; runs
        # once per call.  Present-but-fully-masked class: counts == 0 -> NaN row,
        # matching the torch 0/0 behavior (absent classes selected out below).
        r = pl.reciprocal(counts, approx=True)
        r = r * (2.0 - counts * r)
        avg = sum_ref[...] * r
        blended = decay * avg + (1.0 - decay) * cent
        out_ref[...] = jnp.where(present, blended, cent).astype(out_ref.dtype)


def _default_vmem_limit_bytes():
    """~80% of this generation's physical VMEM (v5e/v6e: 128 MiB, v7x: 64 MiB)."""
    try:
        cap = int(pltpu.get_tpu_info().vmem_capacity_bytes)
    except Exception:
        cap = 64 * 1024 * 1024      # conservative fallback (v7x per-TC VMEM)
    return max(16 * 1024 * 1024, int(cap * 0.8))


def _choose_tile_n(n, tile_f, c, x_itemsize, cent_itemsize, out_itemsize,
                   vmem_budget_bytes, bufs=2):
    """Byte-targeted N tile: multiple of 128, as large as the VMEM budget allows
    (soft-capped at ~16 MiB of x per buffer), never larger than N rounded to 128."""
    # Bytes that scale with TN:
    per_row = (bufs * tile_f * x_itemsize            # x tile, double-buffered
               + bufs * (4 + 4)                      # y (int32) + mask (f32) tiles
               + c * (2 * x_itemsize + 4 + 4))       # one-hot / masked one-hot / f32 one-hot / cnt_rhs temporaries
    # Resident across the N loop (per F block):
    resident = (c * tile_f * (2 * cent_itemsize + 2 * out_itemsize + 4)   # cent + out (buffered) + f32 sum scratch
                + c * 128 * 4)                                            # cnt scratch (lane-padded)
    headroom = 2 * 1024 * 1024
    budget = max(vmem_budget_bytes - resident - headroom, 128 * per_row)
    tn = (int(budget // per_row) // 128) * 128
    # Soft cap: ~16 MiB of x per buffer already amortizes the ~0.35us/step overhead
    # (>10us of DMA per step even at v7x bandwidth) while keeping >=2 steps in flight.
    tn_cap = max(128, (16 * 1024 * 1024 // max(tile_f * x_itemsize, 1)) // 128 * 128)
    tn = max(128, min(tn, tn_cap))
    n128 = -(-n // 128) * 128
    return min(tn, max(128, n128))


def centroids_forward(x, y, centroids, y_mask=None, decay_const=0.3,
                      tile_n=None, tile_f=None, vmem_limit_bytes=None):
    """JAX/Pallas equivalent of Centroids.forward(x, y, y_mask)."""
    n, f = x.shape
    c, f2 = centroids.shape
    assert f == f2
    out_dtype = centroids.dtype

    if vmem_limit_bytes is None:
        vmem_limit_bytes = _default_vmem_limit_bytes()

    # F tiling: 2 feature blocks whenever possible so the leading "parallel" grid
    # axis feeds both v7x TensorCores; otherwise a single full-F block.
    if tile_f is None:
        tile_f = f // 2 if (f % 256 == 0) else f
    assert f % tile_f == 0 and (tile_f % 128 == 0 or tile_f == f)

    if tile_n is None:
        tile_n = _choose_tile_n(n, tile_f, c,
                                jnp.dtype(x.dtype).itemsize,
                                jnp.dtype(centroids.dtype).itemsize,
                                jnp.dtype(out_dtype).itemsize,
                                vmem_limit_bytes)
    assert tile_n % 128 == 0, "N tile must be a multiple of 128 (lane / MXU contraction width)"

    grid_n = -(-n // tile_n)
    n_pad = grid_n * tile_n
    ragged = (n_pad != n)

    y2 = y.astype(jnp.int32).reshape(1, n)
    if y_mask is None:
        m2 = jnp.ones((1, n), jnp.float32)
    else:
        m2 = y_mask.astype(jnp.float32).reshape(1, n)
    if ragged:
        # Only the tiny (1, N) label/mask rows get a host-side pad; the big x
        # stream is NOT copied — its ragged tail is masked inside the kernel.
        y2 = jnp.pad(y2, ((0, 0), (0, n_pad - n)), constant_values=-1)
        m2 = jnp.pad(m2, ((0, 0), (0, n_pad - n)))

    kernel = functools.partial(_centroids_kernel, num_classes=c,
                               decay=float(decay_const), n_samples=n,
                               tile_n=tile_n, ragged=ragged)

    grid = (f // tile_f, grid_n)
    return pl.pallas_call(
        kernel,
        out_shape=jax.ShapeDtypeStruct((c, f), out_dtype),
        grid_spec=pltpu.PrefetchScalarGridSpec(
            num_scalar_prefetch=0,
            grid=grid,
            in_specs=[
                pl.BlockSpec((1, tile_n), lambda fj, i: (0, i)),        # y
                pl.BlockSpec((1, tile_n), lambda fj, i: (0, i)),        # mask
                pl.BlockSpec((tile_n, tile_f), lambda fj, i: (i, fj)),  # x (streamed)
                pl.BlockSpec((c, tile_f), lambda fj, i: (0, fj)),       # centroids (resident per F block)
            ],
            out_specs=pl.BlockSpec((c, tile_f), lambda fj, i: (0, fj)), # output (resident per F block)
            scratch_shapes=[
                pltpu.VMEM((c, tile_f), jnp.float32),   # per-class feature sums
                pltpu.VMEM((c, 2), jnp.float32),        # [masked count, presence count]
            ],
        ),
        compiler_params=pltpu.CompilerParams(
            dimension_semantics=("parallel", "arbitrary"),   # F parallel (2nd TC on v7x), N reduction
            vmem_limit_bytes=int(vmem_limit_bytes),
        ),
    )(y2, m2, x, centroids)


def _reference_forward(x, y, centroids, y_mask=None, decay_const=0.3):
    """Pure-JAX reference mirroring the PyTorch loop."""
    c_total, _ = centroids.shape
    rows = []
    for cl in range(c_total):
        is_c = (y == cl)
        if bool(is_c.any()):
            m = is_c if y_mask is None else (is_c & y_mask)
            cnt = m.sum().astype(jnp.float32)
            avg = (x.astype(jnp.float32) * m[:, None].astype(jnp.float32)).sum(axis=0) / cnt
            rows.append(decay_const * avg + (1.0 - decay_const) * centroids[cl])
        else:
            rows.append(centroids[cl])
    return jnp.stack(rows, axis=0)


if __name__ == "__main__":
    key = jax.random.PRNGKey(0)
    kx, ky, kc = jax.random.split(key, 3)

    num_classes = 8
    feature_dim = 256    # two 128-wide F blocks -> exercises the "parallel" F axis
    num_samples = 384

    x = jax.random.normal(kx, (num_samples, feature_dim), dtype=jnp.float32)
    # Labels drawn from [0, num_classes - 1) so the last class is absent,
    # exercising the "class not present -> keep old centroid" branch.
    y = jax.random.randint(ky, (num_samples,), 0, num_classes - 1, dtype=jnp.int32)
    # Non-zero centroid buffer: reset_parameters() zero-inits it, but the forward
    # semantics hold for any buffer value and this exercises the EMA blend + the
    # absent-class passthrough meaningfully.
    centroids = jax.random.normal(kc, (num_classes, feature_dim), dtype=jnp.float32)
    # Mask out the first 16 samples; every present class keeps unmasked samples.
    y_mask = jnp.arange(num_samples) >= 16

    # 1) No mask, budget-driven tiles (single N step, 2 parallel F blocks).
    out1 = jax.block_until_ready(centroids_forward(x, y, centroids, None, 0.3))
    ref1 = _reference_forward(x, y, centroids, None, 0.3)
    assert jnp.allclose(out1, ref1, atol=2e-5, rtol=1e-4), float(jnp.max(jnp.abs(out1 - ref1)))

    # 2) With mask and a forced tile_n=256 -> ragged last N tile (grid (2, 2)),
    #    exercising the in-kernel tail masking (no host-side pad copy of x).
    out2 = jax.block_until_ready(centroids_forward(x, y, centroids, y_mask, 0.3, tile_n=256))
    ref2 = _reference_forward(x, y, centroids, y_mask, 0.3)
    assert jnp.allclose(out2, ref2, atol=2e-5, rtol=1e-4), float(jnp.max(jnp.abs(out2 - ref2)))

    print("KERNEL_OK")
</pallas_src>

<mosaic_0001>
module attributes {stable_mosaic.version = 11 : i64} {
  func.func @_centroids_kernel(%arg0: i32, %arg1: i32, %arg2: memref<1x384xi32, #tpu.memory_space<vmem>>, %arg3: memref<1x384xf32, #tpu.memory_space<vmem>>, %arg4: memref<384x128xf32, #tpu.memory_space<vmem>>, %arg5: memref<8x128xf32, #tpu.memory_space<vmem>>, %arg6: memref<8x128xf32, #tpu.memory_space<vmem>>, %arg7: memref<8x128xf32, #tpu.memory_space<vmem>>, %arg8: memref<8x2xf32, #tpu.memory_space<vmem>>) attributes {dimension_semantics = [#tpu.dimension_semantics<parallel>, #tpu.dimension_semantics<arbitrary>], iteration_bounds = array<i64: 2, 1>, scalar_prefetch = 0 : i64, scratch_operands = 2 : i64, tpu.core_type = #tpu.core_type<tc>, window_params = [{transform_indices = @transform_0, window_bounds = array<i64: 1, 384>}, {transform_indices = @transform_1, window_bounds = array<i64: 1, 384>}, {transform_indices = @transform_2, window_bounds = array<i64: 384, 128>}, {transform_indices = @transform_3, window_bounds = array<i64: 8, 128>}, {transform_indices = @transform_4, window_bounds = array<i64: 8, 128>}]} {
    %c0_i32 = arith.constant 0 : i32
    %0 = arith.cmpi eq, %arg1, %c0_i32 : i32
    %1 = arith.extui %0 : i1 to i32
    %c0_i32_0 = arith.constant 0 : i32
    %2 = arith.cmpi ne, %1, %c0_i32_0 : i32
    scf.if %2 {
      %cst_18 = arith.constant 0.000000e+00 : f32
      %28 = vector.broadcast %cst_18 : f32 to vector<8x128xf32>
      %c0_19 = arith.constant 0 : index
      %c0_20 = arith.constant 0 : index
      %29 = vector.load %arg7[%c0_19, %c0_20] : memref<8x128xf32, #tpu.memory_space<vmem>>, vector<8x128xf32>
      tpu.vector_store %arg7[%c0_19, %c0_20], %28 {strides = array<i32>} : memref<8x128xf32, #tpu.memory_space<vmem>>, vector<8x128xf32>,
      %cst_21 = arith.constant 0.000000e+00 : f32
      %30 = vector.broadcast %cst_21 : f32 to vector<8x2xf32>
      %c0_22 = arith.constant 0 : index
      %c0_23 = arith.constant 0 : index
      %31 = vector.load %arg8[%c0_22, %c0_23] : memref<8x2xf32, #tpu.memory_space<vmem>>, vector<8x2xf32>
      tpu.vector_store %arg8[%c0_22, %c0_23], %30 {strides = array<i32>} : memref<8x2xf32, #tpu.memory_space<vmem>>, vector<8x2xf32>,
    } else {
    }
    %c0 = arith.constant 0 : index
    %c0_1 = arith.constant 0 : index
    %3 = vector.load %arg2[%c0, %c0_1] : memref<1x384xi32, #tpu.memory_space<vmem>>, vector<1x384xi32>
    %c0_2 = arith.constant 0 : index
    %c0_3 = arith.constant 0 : index
    %4 = vector.load %arg3[%c0_2, %c0_3] : memref<1x384xf32, #tpu.memory_space<vmem>>, vector<1x384xf32>
    %c0_4 = arith.constant 0 : index
    %c0_5 = arith.constant 0 : index
    %5 = vector.load %arg4[%c0_4, %c0_5] : memref<384x128xf32, #tpu.memory_space<vmem>>, vector<384x128xf32>
    %6 = tpu.iota {dimensions = array<i32: 0>} : vector<8x384xi32>
    %7 = vector.broadcast %3 : vector<1x384xi32> to vector<8x384xi32>
    %8 = arith.cmpi eq, %7, %6 : vector<8x384xi32>
    %9 = arith.extui %8 : vector<8x384xi1> to vector<8x384xi32>
    %10 = arith.sitofp %9 : vector<8x384xi32> to vector<8x384xf32>
    %11 = vector.broadcast %4 : vector<1x384xf32> to vector<8x384xf32>
    %12 = arith.mulf %10, %11 : vector<8x384xf32>
    %c0_6 = arith.constant 0 : index
    %c0_7 = arith.constant 0 : index
    %13 = vector.load %arg7[%c0_6, %c0_7] : memref<8x128xf32, #tpu.memory_space<vmem>>, vector<8x128xf32>
    %cst = arith.constant dense<0.000000e+00> : vector<8x128xf32>
    %14 = tpu.matmul %12, %5, %cst {dimension_numbers = #tpu.dot_dimension_numbers<[1], [0], [0], [1], [0, 0, 1, 1], [], []>} : vector<8x384xf32>, vector<384x128xf32>, vector<8x128xf32> -> vector<8x128xf32>
    %15 = arith.addf %13, %14 : vector<8x128xf32>
    %c0_8 = arith.constant 0 : index
    %c0_9 = arith.constant 0 : index
    %16 = vector.load %arg7[%c0_8, %c0_9] : memref<8x128xf32, #tpu.memory_space<vmem>>, vector<8x128xf32>
    tpu.vector_store %arg7[%c0_8, %c0_9], %15 {strides = array<i32>} : memref<8x128xf32, #tpu.memory_space<vmem>>, vector<8x128xf32>,
    %17 = arith.extui %8 : vector<8x384xi1> to vector<8x384xi32>
    %18 = arith.sitofp %17 : vector<8x384xi32> to vector<8x384xf32>
    %cst_10 = arith.constant 1.000000e+00 : f32
    %19 = vector.broadcast %cst_10 : f32 to vector<1x384xf32>
    %20 = tpu.concatenate %4, %19 in 0 : vector<1x384xf32>, vector<1x384xf32> -> vector<2x384xf32>
    %c0_11 = arith.constant 0 : index
    %c0_12 = arith.constant 0 : index
    %21 = vector.load %arg8[%c0_11, %c0_12] : memref<8x2xf32, #tpu.memory_space<vmem>>, vector<8x2xf32>
    %cst_13 = arith.constant dense<0.000000e+00> : vector<8x2xf32>
    %22 = tpu.matmul %18, %20, %cst_13 {dimension_numbers = #tpu.dot_dimension_numbers<[1], [1], [0], [0], [0, 0, 1, 0], [], []>} : vector<8x384xf32>, vector<2x384xf32>, vector<8x2xf32> -> vector<8x2xf32>
    %23 = arith.addf %21, %22 : vector<8x2xf32>
    %c0_14 = arith.constant 0 : index
    %c0_15 = arith.constant 0 : index
    %24 = vector.load %arg8[%c0_14, %c0_15] : memref<8x2xf32, #tpu.memory_space<vmem>>, vector<8x2xf32>
    tpu.vector_store %arg8[%c0_14, %c0_15], %23 {strides = array<i32>} : memref<8x2xf32, #tpu.memory_space<vmem>>, vector<8x2xf32>,
    %c0_i32_16 = arith.constant 0 : i32
    %25 = arith.cmpi eq, %arg1, %c0_i32_16 : i32
    %26 = arith.extui %25 : i1 to i32
    %c0_i32_17 = arith.constant 0 : i32
    %27 = arith.cmpi ne, %26, %c0_i32_17 : i32
    scf.if %27 {
      %c0_18 = arith.constant 0 : index
      %c0_19 = arith.constant 0 : index
      %28 = vector.load %arg5[%c0_18, %c0_19] : memref<8x128xf32, #tpu.memory_space<vmem>>, vector<8x128xf32>
      %c0_20 = arith.constant 0 : index
      %c0_21 = arith.constant 0 : index
      %29 = vector.load %arg8[%c0_20, %c0_21] : memref<8x2xf32, #tpu.memory_space<vmem>>, vector<8x1xf32>
      %c0_22 = arith.constant 0 : index
      %c1 = arith.constant 1 : index
      %30 = vector.load %arg8[%c0_22, %c1] : memref<8x2xf32, #tpu.memory_space<vmem>>, vector<8x1xf32>
      %cst_23 = arith.constant 0.000000e+00 : f32
      %31 = vector.broadcast %cst_23 : f32 to vector<8x1xf32>
      %32 = arith.cmpf ogt, %30, %31 : vector<8x1xf32>
      %33 = tpu.reciprocal %29 {approx = true} : vector<8x1xf32> -> vector<8x1xf32>
      %34 = arith.mulf %29, %33 : vector<8x1xf32>
      %cst_24 = arith.constant 2.000000e+00 : f32
      %35 = vector.broadcast %cst_24 : f32 to vector<8x1xf32>
      %36 = arith.subf %35, %34 : vector<8x1xf32>
      %37 = arith.mulf %33, %36 : vector<8x1xf32>
      %c0_25 = arith.constant 0 : index
      %c0_26 = arith.constant 0 : index
      %38 = vector.load %arg7[%c0_25, %c0_26] : memref<8x128xf32, #tpu.memory_space<vmem>>, vector<8x128xf32>
      %39 = vector.broadcast %37 : vector<8x1xf32> to vector<8x128xf32>
      %40 = arith.mulf %38, %39 : vector<8x128xf32>
      %cst_27 = arith.constant 3.000000e-01 : f32
      %41 = vector.broadcast %cst_27 : f32 to vector<8x128xf32>
      %42 = arith.mulf %41, %40 : vector<8x128xf32>
      %cst_28 = arith.constant 0.699999988 : f32
      %43 = vector.broadcast %cst_28 : f32 to vector<8x128xf32>
      %44 = arith.mulf %43, %28 : vector<8x128xf32>
      %45 = arith.addf %42, %44 : vector<8x128xf32>
      %46 = vector.shape_cast %32 : vector<8x1xi1> to vector<8x1xi1>
      %47 = vector.broadcast %46 : vector<8x1xi1> to vector<8x128xi1>
      %48 = arith.select %47, %45, %28 : vector<8x128xi1>, vector<8x128xf32>
      %c0_29 = arith.constant 0 : index
      %c0_30 = arith.constant 0 : index
      %49 = vector.load %arg6[%c0_29, %c0_30] : memref<8x128xf32, #tpu.memory_space<vmem>>, vector<8x128xf32>
      tpu.vector_store %arg6[%c0_29, %c0_30], %48 {strides = array<i32>} : memref<8x128xf32, #tpu.memory_space<vmem>>, vector<8x128xf32>,
    } else {
    }
    return
  }
  func.func @transform_0(%arg0: i32, %arg1: i32) -> (i32, i32) {
    %c0_i32 = arith.constant 0 : i32
    %c0_i32_0 = arith.constant 0 : i32
    return %c0_i32, %arg1 : i32, i32
  }
  func.func @transform_1(%arg0: i32, %arg1: i32) -> (i32, i32) {
    %c0_i32 = arith.constant 0 : i32
    %c0_i32_0 = arith.constant 0 : i32
    return %c0_i32, %arg1 : i32, i32
  }
  func.func @transform_2(%arg0: i32, %arg1: i32) -> (i32, i32) {
    %c0_i32 = arith.constant 0 : i32
    return %arg1, %arg0 : i32, i32
  }
  func.func @transform_3(%arg0: i32, %arg1: i32) -> (i32, i32) {
    %c0_i32 = arith.constant 0 : i32
    %c0_i32_0 = arith.constant 0 : i32
    return %c0_i32, %arg0 : i32, i32
  }
  func.func @transform_4(%arg0: i32, %arg1: i32) -> (i32, i32) {
    %c0_i32 = arith.constant 0 : i32
    %c0_i32_0 = arith.constant 0 : i32
    return %c0_i32, %arg0 : i32, i32
  }
}

</mosaic_0001>

<bundles_post_ra>
// kernel: tpu_custom_call.1
= control target key start
LH: loop header
LB: loop body
LE: loop exit
PB: predicated region body
PF: predicated region fallthrough
CT: control target
= control target key end

     0   :  { %s1645_s0 = inlined_call_operand.hbm [shape: s32[1,384], index: 0, kind: input, shape index: {}]   ;;  %s1646_s1 = inlined_call_operand.hbm [shape: f32[1,384], index: 1, kind: input, shape index: {}]   ;;  %s1647_s2 = inlined_call_operand.hbm [shape: f32[384,256], index: 2, kind: input, shape index: {}]   ;;  %s1648_s3 = inlined_call_operand.hbm [shape: f32[8,256], index: 3, kind: input, shape index: {}]   ;;  %s1649_s4 = inlined_call_operand.hbm [shape: f32[8,256], index: 4, kind: output, shape index: {}]  }
   0x1   :  { %1654 = sst [smem:[#allocation17_spill]] %s1645_s0 }
   0x2   :  { %1655 = sst [smem:[#allocation18_spill]] %s1647_s2 }
   0x3   :  { %9 = vsyncpa [#allocation5], 0 }
   0x4   :  { %10 = vsyncpa [#allocation8], 0 }
   0x5   :  { %11 = vsyncpa [#allocation6], 0 }
   0x6   :  { %13 = vsyncpa [#allocation6 + $0x1], 0  ;;  %s1318_s15 = smov 0   ;;  %s1320_s16 = smov 0  }
   0x7   :  { %s1322_s17 = smov 0   ;;  %s1324_s18 = smov 0  }
   0x8   :  { %s1326_s19 = smov 0   ;;  %s1328_s20 = smov 0  }
   0x9 LB: > { %s1349_s21 = sadd.s32 4294967295, %s1278_s20   ;;  %s863_s22 = sadd.s32 4294967294, %s1278_s20   ;;  %s1278_s20 = sphi %s1328_s20, %s19_s20   ;;  %s1274_s19 = sphi %s1326_s19, %s1680_s19   ;;  %s1270_s18 = sphi %s1324_s18, %s1679_s18   ;;  %s1266_s17 = sphi %s1322_s17, %s1678_s17   ;;  %s1262_s16 = sphi %s1320_s16, %s1677_s16   ;;  %s1258_s15 = sphi %s1318_s15, %s1676_s15  }
   0xa   : > { %s92_s23 = sadd.s32 1, %s1266_s17  ;;  %p99_p0 = scmp.ne.s32.totalorder %s1266_s17, %s1262_s16 }
   0xb   : > { %p100_p1 = scmp.eq.s32.totalorder %s1278_s20, 0  ;;  %p105_p2 = scmp.ne.s32.totalorder %s1262_s16, %s1258_s15 }
   0xc   : > { %p1650_p3 = scmp.eq.s32.totalorder %s1349_s21, 0  ;;  %p155_p4 = scmp.eq.s32.totalorder %s1349_s21, 1 }
   0xd   : > { %p1360_p5 = por %p100_p1, %p99_p0  ;;  %p161_p6 = scmp.eq.s32.totalorder %s863_s22, 1 }
   0xe   : > { %p1366_p7 = por %p1650_p3, %p105_p2  ;;  %p1370_p8 = por %p155_p4, %p99_p0 }
   0xf   : > { %p1374_p9 = por %p161_p6, %p105_p2  ;;  %p864_p10 = scmp.ge.s32.totalorder %s1278_s20, 1 }
  0x10   : > { %p168_p11 = scmp.lt.s32.totalorder %s1278_s20, 3  ;;  %s1280_s29 = smov [#allocation4]  }
  0x11   : > { %s1659_s27 = scalar_select %p1374_p9, 1, 0 }
  0x12   : > { %p1381_p13 = pnand %p864_p10, %p168_p11  ;;  %s184_s30 = sshll.u32 %s1280_s29, 4  ;;  %s185_s30 = int_to_ptr.vmem [resolvable:$true] %s184_s30 }
  0x13   : > { %p1016_p1 = scmp.lt.s32.totalorder %s1278_s20, 2  ;;  %s31_s7 = sadd.s32 1, %s1274_s19 }
  0x14   : > { %p996_p0 = pneg %p1381_p13  ;;  %p1401_p6 = scmp.ge.s32.totalorder %s31_s7, 2 }
  0x15   : > { %p1390_p4 = pnand %p1016_p1, %p1360_p5  ;;  %s209_s9 = sand.u32 1, %s1278_s20  }
  0x16   : > { %p1396_p2 = pnand %p996_p0, %p1650_p3  ;;  %s1093_s10 = scalar_lea.vmem %s185_s30, 48 }
  0x17   : > { %p1094_p5 = scmp.ne.s32.totalorder %s185_s30, %s1093_s10  ;;  %s1100_s11 = scalar_lea.vmem %s185_s30, 64 }
  0x18   : > { %p1084_p10 = pneg %p1396_p2  ;;  %p1101_p0 = scmp.lt.s32.totalorder %s185_s30, %s185_s30 }
  0x19   : > { %p1102_p12 = scmp.lt.s32.totalorder %s1100_s11, %s1093_s10 }
  0x1a   : > { %p1096_p11 = pnand %p1094_p5, %p1084_p10 }
  0x1b   : > { %p1103_p3 = por %p1102_p12, %p1101_p0 }
  0x1c   : > { %p1097_p1 = pneg %p1096_p11 }
  0x1e   : > { %p1104_p9 = pnand %p1103_p3, %p1097_p1 }
  0x20   : > { %1107 = shalt.err (!%p1104_p9)
}
  0x21   : > { %s1664_s0 = sld [smem:[#allocation17_spill]]  ;;  %s1682_s7 = smov (%p1401_p6, %s31_s7), 0 }
  0x22   : > { %1665 = sst [smem:[#allocation16_spill]] %s1682_s7  ;;  %s1652_s14 = sand.u32 1, %s1266_s17  }
  0x23   : > { %s88_s22 = ssub.s32 %s1274_s19, %s1682_s7  ;;  %s980_s24 = smul.u32 384, %s1652_s14 }
  0x24   : > { %p90_p3 = scmp.eq.s32.totalorder %s88_s22, 0  ;;  %s1653_s29 = sshll.u32 %s1274_s19, 7 }
  0x25   : > { %s1666_s2 = sld [smem:[#allocation18_spill]]  ;;  %p1110_p9 = pneg %p1390_p4 }
  0x26   : > { %s1434_s13 = scalar_select %p90_p3, %s1266_s17, %s92_s23  }
  0x27   : > { %999 = dma.hbm_to_vmem [thread:$0]  (!%p1396_p2), %s1664_s0, 48, %s185_s30, [#allocation5]  }
  0x28   : > { %s213_s30 = scalar_lea.vmem [#allocation9], %s980_s24  ;;  %s1436_s0 = scalar_lea.sflag [#allocation5], %s209_s9 }
  0x29   : > { %s222_s8 = sshll.u32 %s213_s30, 4  ;;  %s1281_s22 = smov [#allocation9]   ;;  %s223_s8 = int_to_ptr.vmem [resolvable:$true] %s222_s8 }
  0x2a   : > { %s1121_s7 = scalar_lea.vmem %s223_s8, 6144  ;;  %s1126_s14 = sshll.u32 %s1281_s22, 4  ;;  %s1127_s14 = int_to_ptr.vmem [resolvable:$false] %s1126_s14 }
  0x2b   : > { %s221_s12 = scalar_lea.hbm %s1666_s2, %s1653_s29  ;;  %p1122_p12 = scmp.ne.s32.totalorder %s223_s8, %s1121_s7 }
  0x2c   : > { %s1128_s10 = scalar_lea.vmem %s1127_s14, 12288  ;;  %p1129_p11 = scmp.lt.s32.totalorder %s223_s8, %s1127_s14 }
  0x2d   : > { %p1124_p6 = pnand %p1122_p12, %p1110_p9  ;;  %p1130_p1 = scmp.lt.s32.totalorder %s1128_s10, %s1121_s7 }
  0x2f   : > { %p1125_p5 = pneg %p1124_p6  ;;  %p1131_p0 = por %p1130_p1, %p1129_p11 }
  0x31   : > { %p1132_p3 = pnand %p1131_p0, %p1125_p5 }
  0x33   : > { %1135 = shalt.err (!%p1132_p3)
}
  0x34   : > { %s1282_s23 = smov 256   ;;  %s1283_s9 = smov 128  }
  0x35   : > { %s1284_s24 = smov 8   ;;  %s1285_s11 = smov [#allocation7]  }
  0x36   : > { %1006 = dma.hbm_to_vmem [thread:$0]  (!%p1390_p4), %s221_s12, 6144, %s223_s8, %s1436_s0, %s1282_s23, %s1283_s9, %s1284_s24  }
  0x37   : > { %s198_s30 = sshll.u32 %s1285_s11, 4  ;;  %s1667_s29 = sand.u32 1, %s1266_s17   ;;  %s199_s30 = int_to_ptr.vmem [resolvable:$true] %s198_s30 }
  0x38   : > { %s869_s22 = sshll.u32 %s1667_s29, 3  ;;  %s1147_s2 = scalar_lea.vmem %s199_s30, 48 }
  0x39   : > { %p1148_p12 = scmp.ne.s32.totalorder %s199_s30, %s1147_s2  ;;  %s1154_s7 = scalar_lea.vmem %s199_s30, 64 }
  0x3a   : > { %p1155_p11 = scmp.lt.s32.totalorder %s199_s30, %s199_s30  ;;  %p1156_p1 = scmp.lt.s32.totalorder %s1154_s7, %s1147_s2 }
  0x3b   : > { %p1150_p6 = pnand %p1148_p12, %p1084_p10 }
  0x3c   : > { %p1157_p0 = por %p1156_p1, %p1155_p11 }
  0x3d   : > { %p1151_p5 = pneg %p1150_p6 }
  0x3f   : > { %p1158_p3 = pnand %p1157_p0, %p1151_p5 }
  0x41   : > { %1161 = shalt.err (!%p1158_p3)
}
  0x42   : > { %1002 = dma.hbm_to_vmem [thread:$0]  (!%p1396_p2), %s1646_s1, 48, %s199_s30, [#allocation8]  }
  0x43   : > { %s1668_s29 = sshll.u32 %s1274_s19, 7  ;;  %s236_s9 = scalar_lea.vmem [#allocation10], %s869_s22 }
  0x44   : > { %s241_s23 = scalar_lea.hbm %s1648_s3, %s1668_s29  ;;  %s243_s24 = sshll.u32 %s236_s9, 4  ;;  %s244_s24 = int_to_ptr.vmem [resolvable:$true] %s243_s24 }
  0x45   : > { %s1175_s2 = scalar_lea.vmem %s244_s24, 128  ;;  %s1286_s6 = smov [#allocation10]  }
  0x46   : > { %p1176_p10 = scmp.ne.s32.totalorder %s244_s24, %s1175_s2  ;;  %s1180_s11 = sshll.u32 %s1286_s6, 4  ;;  %s1181_s11 = int_to_ptr.vmem [resolvable:$false] %s1180_s11 }
  0x47   : > { %s1182_s7 = scalar_lea.vmem %s1181_s11, 256  ;;  %p1183_p5 = scmp.lt.s32.totalorder %s244_s24, %s1181_s11 }
  0x48   : > { %p1178_p12 = pnand %p1176_p10, %p1110_p9  ;;  %p1184_p2 = scmp.lt.s32.totalorder %s1182_s7, %s1175_s2 }
  0x4a   : > { %p1179_p6 = pneg %p1178_p12  ;;  %p1185_p11 = por %p1184_p2, %p1183_p5 }
  0x4c   : > { %p1186_p1 = pnand %p1185_p11, %p1179_p6 }
  0x4e   : > { %1189 = shalt.err (!%p1186_p1)
}
  0x4f   : > { %1009 = dma.hbm_to_vmem [thread:$0]  (!%p1390_p4), %s241_s23, 128, %s244_s24, %s1436_s0  }
  0x50   : > { %252 = sbr.rel (%p1381_p13) target bundleno = 502 (0x1f6), region = 36  ;;  %p1669_p0 = scmp.eq.s32.totalorder (!%p1381_p13), %s1349_s21, 0 }
  0x55   : > { %1241 = dma.done.wait (%p1669_p0), [#allocation5], 48   ;;  %p1670_p9 = pmov %p1669_p0 }
  0x56   : > { %p1671_p3 = pmov %p1669_p0 }
  0x57   : > { %1243 = vsyncadd (%p1670_p9), [#allocation5], 4294967248 }
  0x58   : > { %1245 = dma.done.wait (%p1671_p3), [#allocation8], 48   ;;  %p1672_p10 = pmov %p1669_p0 }
  0x59   : > { %s262_s5 = sand.u32 1, %s1349_s21   ;;  %s1479_s0 = sand.u32 1, %s1262_s16  }
  0x5a   : > { %1247 = vsyncadd (%p1672_p10), [#allocation8], 4294967248  ;;  %s981_s28 = smul.u32 384, %s1479_s0  ;;  %s263_s30 = scalar_lea.sflag [#allocation5], %s262_s5 }
  0x5c   : > { %s1482_s22 = scalar_lea.vmem [#allocation9], %s981_s28 }
  0x5d   : > { %1249 = dma.done.wait (%p1366_p7), %s263_s30, 6272  }
  0x5e   : > { %1251 = vsyncadd (%p1366_p7), %s263_s30, 4294961024  ;;  %v1287_v0 = vmov 0.0   ;;  %vm1288_vm0 = vmmov 0   ;;  %v348_v1 = vld [vmem:[%s1482_s22 + $0xf8] sm:$0xff]  ;;  %v347_v4 = vld [vmem:[%s1482_s22 + $0xf0] sm:$0xff]  ;;  %v365_v15 = vlaneseq  ;;  %vm550_vm4 = vcmask 1040384  }
  0x5f   : > { %940 = vmatprep.subr.mxu1 %v1287_v0  ;;  %972 = vmatprep.mubr.msk.f32.mxu1 %vm1288_vm0, %v1287_v0  ;;  %v364_v2 = vld [vmem:[%s1482_s22 + $0x178] sm:$0xff]  ;;  %v363_v5 = vld [vmem:[%s1482_s22 + $0x170] sm:$0xff]  ;;  %v346_v7 = vld [vmem:[%s1482_s22 + $0xe8] sm:$0xff]  ;;  %vm313_vm5 = vcmask 15360   ;;  %s874_s21 = sshll.u32 %s1479_s0, 3  ;;  %s883_s14 = sshll.u32 %s1270_s18, 7 }
  0x60   : > { %v332_v3 = vld [vmem:[%s1482_s22 + $0x78] sm:$0xff]  ;;  %886 = vmatprep.subr.mxu0 %v348_v1  ;;  %941 = vmatpush3.msra.mxu1 %v364_v2  ;;  %v331_v6 = vld [vmem:[%s1482_s22 + $0x70] sm:$0xff]  ;;  %v362_v8 = vld [vmem:[%s1482_s22 + $0x168] sm:$0xff]  ;;  %v1516_v22 = vshrl.u32 %v365_v15, 7  ;;  %314 = vst.msk [vmem:[#allocation3] sm:$0xff] %vm313_vm5, %v1287_v0  ;;  %s275_s25 = scalar_lea.vmem [#allocation10], %s874_s21  ;;  %s1603_s23 = scalar_lea.hbm %s1649_s4, %s883_s14 }
  0x61   : > { %887 = vmatpush3.msra.mxu0 %v332_v3  ;;  %942 = vmatprep.subr.mxu1 %v1287_v0  ;;  %v330_v9 = vld [vmem:[%s1482_s22 + $0x68] sm:$0xff]  ;;  %v345_v10 = vld [vmem:[%s1482_s22 + $0xe0] sm:$0xff]  ;;  %v344_v13 = vld [vmem:[%s1482_s22 + $0xd8] sm:$0xff]  ;;  %s304_s12 = scalar_lea.vmem [#allocation11], %s874_s21  ;;  %s726_s9 = scalar_lea.sflag [#allocation6], %s1479_s0 }
  0x62   : > { %888 = vmatprep.subr.mxu0 %v347_v4  ;;  %943 = vmatpush3.msra.mxu1 %v363_v5  ;;  %v361_v11 = vld [vmem:[%s1482_s22 + $0x160] sm:$0xff]  ;;  %v360_v14 = vld [vmem:[%s1482_s22 + $0x158] sm:$0xff]  ;;  %v343_v17 = vld [vmem:[%s1482_s22 + $0xd0] sm:$0xff]  ;;  %v373_v29 = vsub.s32 1, %v1516_v22  ;;  %v377_v31 = vsub.s32 2, %v1516_v22  ;;  %v369_v35 = vsub.s32 0, %v1516_v22 }
  0x63   : > { %889 = vmatpush3.msra.mxu0 %v331_v6  ;;  %944 = vmatprep.subr.mxu1 %v1287_v0  ;;  %v329_v12 = vld [vmem:[%s1482_s22 + $0x60] sm:$0xff]  ;;  %v328_v16 = vld [vmem:[%s1482_s22 + $0x58] sm:$0xff]  ;;  %v359_v18 = vld [vmem:[%s1482_s22 + $0x150] sm:$0xff]  ;;  %s739_s29 = sshll.u32 %s304_s12, 4  ;;  %s1292_s18 = smov [#allocation11]   ;;  %s740_s29 = int_to_ptr.vmem [resolvable:$true] %s739_s29 }
  0x64   : > { %890 = vmatprep.subr.mxu0 %v346_v7  ;;  %945 = vmatpush3.msra.mxu1 %v362_v8  ;;  %v327_v19 = vld [vmem:[%s1482_s22 + $0x50] sm:$0xff]  ;;  %v342_v20 = vld [vmem:[%s1482_s22 + $0xc8] sm:$0xff]  ;;  %v341_v24 = vld [vmem:[%s1482_s22 + $0xc0] sm:$0xff]  ;;  %v1289_v8 = vmov 1.0   ;;  %s1190_s24 = scalar_lea.vmem %s740_s29, 128  ;;  %s1194_s2 = sshll.u32 %s1292_s18, 4  ;;  %s1195_s2 = int_to_ptr.vmem [resolvable:$false] %s1194_s2 }
  0x65   : > { %891 = vmatpush3.msra.mxu0 %v330_v9  ;;  %946 = vmatprep.subr.mxu1 %v1287_v0  ;;  %v358_v21 = vld [vmem:[%s1482_s22 + $0x148] sm:$0xff]  ;;  %v357_v25 = vld [vmem:[%s1482_s22 + $0x140] sm:$0xff]  ;;  %v340_v27 = vld [vmem:[%s1482_s22 + $0xb8] sm:$0xff]  ;;  %v1290_v9 = vmov 0   ;;  %p1191_p7 = scmp.ne.s32.totalorder %s740_s29, %s1190_s24  ;;  %s1196_s6 = scalar_lea.vmem %s1195_s2, 256 }
  0x66   : > { %892 = vmatprep.subr.mxu0 %v345_v10  ;;  %947 = vmatpush3.msra.mxu1 %v361_v11  ;;  %v326_v23 = vld [vmem:[%s1482_s22 + $0x48] sm:$0xff]  ;;  %v325_v26 = vld [vmem:[%s1482_s22 + $0x40] sm:$0xff]  ;;  %v356_v28 = vld [vmem:[%s1482_s22 + $0x138] sm:$0xff]  ;;  %p1197_p12 = scmp.lt.s32.totalorder %s740_s29, %s1195_s2  ;;  %p1198_p6 = scmp.lt.s32.totalorder %s1196_s6, %s1190_s24 }
  0x67   : > { %893 = vmatpush3.msra.mxu0 %v329_v12  ;;  %948 = vmatprep.subr.mxu1 %v1287_v0  ;;  %v324_v30 = vld [vmem:[%s1482_s22 + $0x38] sm:$0xff]  ;;  %v339_v32 = vld [vmem:[%s1482_s22 + $0xb0] sm:$0xff]  ;;  %v338_v37 = vld [vmem:[%s1482_s22 + $0xa8] sm:$0xff]  ;;  %p1192_p13 = pnand %p1191_p7, %p1370_p8 }
  0x68   : > { %894 = vmatprep.subr.mxu0 %v344_v13  ;;  %949 = vmatpush3.msra.mxu1 %v360_v14  ;;  %v355_v33 = vld [vmem:[%s1482_s22 + $0x130] sm:$0xff]  ;;  %v315_v34 = vld [vmem:[#allocation4] sm:$0x7]  ;;  %v354_v38 = vld [vmem:[%s1482_s22 + $0x128] sm:$0xff]  ;;  %p1199_p5 = por %p1198_p6, %p1197_p12 }
  0x69   : > { %895 = vmatpush3.msra.mxu0 %v328_v16  ;;  %950 = vmatprep.subr.mxu1 %v1287_v0  ;;  %v323_v36 = vld [vmem:[%s1482_s22 + $0x30] sm:$0xff]  ;;  %v1537_v39 = vrot.slane %v315_v34, %v373_v29  ;;  %v322_v40 = vld [vmem:[%s1482_s22 + $0x28] sm:$0xff]  ;;  %v1540_v41 = vrot.slane %v315_v34, %v377_v31  ;;  %v337_v42 = vld [vmem:[%s1482_s22 + $0xa0] sm:$0xff]  ;;  %v1545_v44 = vrot.slane %v315_v34, %v369_v35  ;;  %p1193_p4 = pneg %p1192_p13 }
  0x6a   : > { %896 = vmatprep.subr.mxu0 %v343_v17  ;;  %951 = vmatpush3.msra.mxu1 %v359_v18  ;;  %v353_v43 = vld [vmem:[%s1482_s22 + $0x120] sm:$0xff]  ;;  %v316_v46 = vld [vmem:[#allocation7] sm:$0x7]  ;;  %v335_v50 = vld [vmem:[%s1482_s22 + $0x90] sm:$0xff] }
  0x6b   : > { %897 = vmatpush3.msra.mxu0 %v327_v19  ;;  %952 = vmatprep.subr.mxu1 %v1287_v0  ;;  %v321_v45 = vld [vmem:[%s1482_s22 + $0x20] sm:$0xff]  ;;  %v336_v47 = vld [vmem:[%s1482_s22 + $0x98] sm:$0xff]  ;;  %vm380_vm1 = vcmp.eq.s32.totalorder %v1537_v39, %v1516_v22  ;;  %vm381_vm2 = vcmp.eq.s32.totalorder %v1540_v41, %v1516_v22  ;;  %v351_v51 = vld [vmem:[%s1482_s22 + $0x110] sm:$0xff]  ;;  %v396_v52 = vrot.slane %v316_v46, %v373_v29  ;;  %p1200_p2 = pnand %p1199_p5, %p1193_p4 }
  0x6c   : > { %898 = vmatprep.subr.mxu0 %v342_v20  ;;  %953 = vmatpush3.msra.mxu1 %v358_v21  ;;  %v352_v48 = vld [vmem:[%s1482_s22 + $0x118] sm:$0xff]  ;;  %vm379_vm3 = vcmp.eq.s32.totalorder %v1545_v44, %v1516_v22  ;;  %v319_v53 = vld [vmem:[%s1482_s22 + $0x10] sm:$0xff]  ;;  %v877_v54 = vsel %vm380_vm1, 1.0, %v1287_v0  ;;  %v400_v55 = vrot.slane %v316_v46, %v377_v31  ;;  %v334_v56 = vld [vmem:[%s1482_s22 + $0x88] sm:$0xff]  ;;  %v878_v58 = vsel %vm381_vm2, 1.0, %v1287_v0 }
  0x6d   : > { %899 = vmatpush3.msra.mxu0 %v326_v23  ;;  %954 = vmatprep.subr.mxu1 %v1287_v0  ;;  %v320_v49 = vld [vmem:[%s1482_s22 + $0x18] sm:$0xff]  ;;  %v350_v57 = vld [vmem:[%s1482_s22 + $0x108] sm:$0xff]  ;;  %v392_v59 = vrot.slane %v316_v46, %v369_v35  ;;  %v876_v61 = vsel %vm379_vm3, 1.0, %v1287_v0  ;;  %v333_v62 = vld [vmem:[%s1482_s22 + $0x80] sm:$0xff]  ;;  %v405_v1 = vmul.f32 %v877_v54, %v396_v52  ;;  %v552_v5 = vsel %vm550_vm4, %v396_v52, 1.0 }
  0x6e   : > { %900 = vmatprep.subr.mxu0 %v341_v24  ;;  %955 = vmatpush3.msra.mxu1 %v357_v25  ;;  %v318_v60 = vld [vmem:[%s1482_s22 + $0x8] sm:$0xff]  ;;  %v349_v63 = vld [vmem:[%s1482_s22 + $0x100] sm:$0xff]  ;;  %v406_v3 = vmul.f32 %v878_v58, %v400_v55  ;;  %v553_v6 = vsel %vm550_vm4, %v400_v55, 1.0  ;;  %v554_v16 = vld [vmem:[#allocation3] sm:$0xff] }
  0x6f   : > { %901 = vmatpush3.msra.mxu0 %v325_v26  ;;  %956 = vmatprep.subr.mxu1 %v1287_v0  ;;  %v317_v2 = vld [vmem:[%s1482_s22] sm:$0xff]  ;;  %v404_v4 = vmul.f32 %v876_v61, %v392_v59  ;;  %v551_v7 = vsel %vm550_vm4, %v392_v59, 1.0 }
  0x70   : > { %902 = vmatprep.subr.mxu0 %v340_v27  ;;  %957 = vmatpush3.msra.mxu1 %v356_v28  ;;  %v1291_v28 = vmov 1   ;;  %v701_v29 = vld [vmem:[%s275_s25] sm:$0xff] }
  0x71   : > { %903 = vmatpush3.msra.mxu0 %v324_v30  ;;  %958 = vmatprep.subr.mxu1 %v1287_v0  ;;  %v716_v31 = vmul.f32 0.7, %v701_v29 }
  0x72   : > { %904 = vmatprep.subr.mxu0 %v339_v32  ;;  %959 = vmatpush3.msra.mxu1 %v355_v33 }
  0x73   : > { %905 = vmatpush3.msra.mxu0 %v323_v36  ;;  %960 = vmatprep.subr.mxu1 %v1287_v0 }
  0x74   : > { %906 = vmatprep.subr.mxu0 %v338_v37  ;;  %961 = vmatpush3.msra.mxu1 %v354_v38 }
  0x75   : > { %907 = vmatpush3.msra.mxu0 %v322_v40  ;;  %962 = vmatprep.subr.mxu1 %v1287_v0 }
  0x76   : > { %908 = vmatprep.subr.mxu0 %v337_v42  ;;  %963 = vmatpush3.msra.mxu1 %v353_v43 }
  0x77   : > { %909 = vmatpush3.msra.mxu0 %v321_v45  ;;  %964 = vmatprep.subr.mxu1 %v1287_v0 }
  0x78   : > { %910 = vmatprep.subr.mxu0 %v336_v47  ;;  %965 = vmatpush3.msra.mxu1 %v352_v48 }
  0x79   : > { %911 = vmatpush3.msra.mxu0 %v320_v49  ;;  %966 = vmatprep.subr.mxu1 %v1287_v0 }
  0x7a   : > { %912 = vmatprep.subr.mxu0 %v335_v50  ;;  %967 = vmatpush3.msra.mxu1 %v351_v51 }
  0x7b   : > { %913 = vmatpush3.msra.mxu0 %v319_v53  ;;  %968 = vmatprep.subr.mxu1 %v1287_v0 }
  0x7c   : > { %914 = vmatprep.subr.mxu0 %v334_v56  ;;  %969 = vmatpush3.msra.mxu1 %v350_v57 }
  0x7d   : > { %915 = vmatpush3.msra.mxu0 %v318_v60  ;;  %970 = vmatprep.subr.mxu1 %v1287_v0 }
  0x7e   : > { %916 = vmatprep.subr.mxu0 %v333_v62  ;;  %971 = vmatpush3.msra.mxu1 %v349_v63 }
  0x7f   : > { %917 = vmatpush3.msra.mxu0 %v317_v2  ;;  %472 = vmatprep.mubr.f32.mxu0 %v405_v1 }
  0x80   : > { %973 = vmatmul.mubr.f32.vlgmr.msra.gmra.mxu1 %v406_v3  ;;  %975 = vmatprep.subr.mxu1 %v1287_v0 }
  0x81   : > { %473 = vmatmul.mubr.f32.vlgmr.msra.gmra.mxu0 %v404_v4  ;;  %585 = vmatprep.subr.mxu0 %v552_v5 }
  0x82   : > { %976 = vmatpush3.xpose.msra.mxu1 %v553_v6  ;;  %586 = vmatpush1.xpose.msra.mxu0 %v551_v7 }
  0x83   : > { %977 = vmatprep.mubr.msk.f32.mxu1 %vm1288_vm0, %v1287_v0  ;;  %879 = vmatprep.mubr.msk.f32.mxu0 %vm380_vm1, %v1289_v8 }
  0x84   : > { %1078 = vset.pattern.permute.xlu0 %v1290_v9 }
  0x85   : > { %978 = vmatmul.mubr.msk.f32.vlgmr.msra.gmra.mxu1 %vm381_vm2, %v1289_v8  ;;  %880 = vmatmul.mubr.msk.f32.vlgmr.msra.gmra.mxu0 %vm379_vm3, %v1289_v8 }
 0x140   : > { %v544_v10 = vpop.f32.mrf.mxu1 }
 0x141   : > { %v918_v11 = vpop.f32.mrf.mxu0 }
 0x142   : > { %v974_v12 = vpop.f32.mrf.mxu1 }
 0x143   : > { %v919_v13 = vpop.f32.mrf.mxu0 }
 0x144   : > { %v920_v14 = vadd.f32 %v919_v13, %v918_v11 }
 0x145   : > { %v691_v15 = vpop.f32.mrf.mxu1  ;;  %v621_v17 = vpop.f32.mrf.mxu0 }
 0x146   : > { %v692_v18 = vadd.f32 %v691_v15, %v621_v17  ;;  %v545_v19 = vadd.f32 %v920_v14, %v544_v10 }
 0x147   : > { %v979_v20 = vpop.f32.mrf.mxu1  ;;  %v623_v21 = vpop.f32.mrf.mxu0 }
 0x148   : > { %v695_v22 = vadd.f32 %v692_v18, %v554_v16 }
 0x14a   : > { %697 = vst.msk [vmem:[#allocation3] sm:$0xff] %vm313_vm5, %v695_v22 }
 0x151   : > { %v702_v23 = vld [vmem:[#allocation3] sm:$0xff] }
 0x152   : > { %1080 = vrcp.f32 %v702_v23  ;;  %vm703_vm6 = vcmp.gt.f32.partialorder %v702_v23, 0.0 }
 0x153   : > { %v718_v27 = vsel %vm703_vm6, 1, %v1290_v9 }
 0x15f   : > { %v1081_v0 = vpop.eup %1080 }
 0x160   : > { %v705_v24 = vmul.f32 %v1081_v0, %v702_v23 }
 0x162   : > { %v706_v25 = vsub.f32 2.0, %v705_v24 }
 0x164   : > { %v707_v26 = vmul.f32 %v1081_v0, %v706_v25 }
 0x166   : > { %711 = vperm.xlu0 %1078, %v707_v26  }
 0x16a   : > { %1079 = vset.pattern.permute.xlu0 %v1291_v28 }
 0x16b   : > { %720 = vperm.xlu0 %1079, %v718_v27  }
 0x1e1   : > { %v712_v30 = vpop.permute.xlu0 %711 }
 0x1e2   : > { %v714_v32 = vmul.f32 %v712_v30, %v545_v19 }
 0x1e4   : > { %v715_v33 = vmul.f32 0.3, %v714_v32 }
 0x1e6   : > { %v717_v34 = vadd.f32 %v716_v31, %v715_v33  ;;  %v721_v35 = vpop.permute.xlu0 %720 }
 0x1e7   : > { %vm722_vm7 = vcmp.eq.s32.totalorder %v721_v35, 1 }
 0x1e8   : > { %v723_v36 = vsel %vm722_vm7, %v717_v34, %v701_v29 }
 0x1e9   : > { %724 = vst [vmem:[%s304_s12] sm:$0xff] %v723_v36 }
 0x1ea   : > { %1203 = shalt.err (!%p1200_p2)
}
 0x1eb   : > { %s1204_s11 = scalar_lea.hbm %s1603_s23, 128  ;;  %s1208_s0 = scalar_lea.hbm %s1649_s4, 256 }
 0x1ec   : > { %p1205_p11 = scmp.ne.s32.totalorder %s1603_s23, %s1204_s11  ;;  %p1209_p9 = scmp.lt.s32.totalorder %s1603_s23, %s1649_s4 }
 0x1ed   : > { %p1210_p3 = scmp.lt.s32.totalorder %s1208_s0, %s1204_s11 }
 0x1ee   : > { %p1206_p1 = pnand %p1205_p11, %p1370_p8 }
 0x1ef   : > { %p1211_p10 = por %p1210_p3, %p1209_p9 }
 0x1f0   : > { %p1207_p0 = pneg %p1206_p1 }
 0x1f2   : > { %p1212_p7 = pnand %p1211_p10, %p1207_p0 }
 0x1f4   : > { %1215 = shalt.err (!%p1212_p7)
}
 0x1f5   : > { %994 = dma.vmem_to_hbm [thread:$0]  (%p1370_p8), %s740_s29, 128, %s1603_s23, %s726_s9  }
 0x1f6 PF: > { %s751_s22 = sand.u32 1, %s1258_s15   ;;  %p1673_p13 = scmp.ne.s32.totalorder %s1659_s27, 0 }
 0x1f7   : > { %p1674_p4 = scmp.ge.s32.totalorder %s1278_s20, 2  ;;  %s752_s21 = scalar_lea.sflag [#allocation6], %s751_s22 }
 0x1f9   : > { %p1011_p12 = pnand %p1674_p4, %p1673_p13 }
 0x1fb   : > { %p1012_p6 = pneg %p1011_p12 }
 0x1fd   : > { %1253 = dma.done.wait (%p1012_p6), %s752_s21, 128  }
 0x1fe   : > { %1255 = vsyncadd (%p1012_p6), %s752_s21, 4294967168  ;;  %s19_s20 = sadd.s32 1, %s1278_s20   ;;  %s1675_s26 = sld [smem:[#allocation16_spill]] }
 0x1ff   : > { %p16_p5 = scmp.ge.s32.totalorder %s19_s20, 4   ;;  %s1676_s15 = smov %s1262_s16 }
 0x200   : > { %s1677_s16 = smov %s1266_s17  ;;  %s1678_s17 = smov %s1434_s13 }
 0x201   : > { %s1679_s18 = smov %s1274_s19  ;;  %18 = sbr.rel (!%p16_p5) target bundleno = 9 (0x9), region = 109 }
 0x204   : > { %s1680_s19 = smov %s1675_s26 }
 0x206   :  { %757 = vsyncpa [#allocation5], 1 }
 0x207   :  { %759 = vsyncpa [#allocation5 + $0x1], 1 }
 0x208   :  { %760 = vsyncpa [#allocation8], 1 }
 0x209   :  { %761 = vsyncpa [#allocation6], 1 }
 0x20a   :  { %763 = vsyncpa [#allocation6 + $0x1], 1 }

</bundles_post_ra>
